<compile_context>
chip_gen: v5e
topology: v5e:2x2
jax: 0.10.0
libtpu: 0.0.40
codegen_flags: <defaults>
</compile_context>

<pallas_src>
import functools

import jax
import jax.numpy as jnp
from jax.experimental import pallas as pl
from jax.experimental.pallas import tpu as pltpu


# ----------------------------------------------------------------------------
# Pallas kernel: theta construction, lane-dense transposed layout
#   u_ref:     (1, TN)         u
#   du_ref:    (D, TN)         non-constant derivative rows [u_x, u_xx, ...]
#   theta_ref: (rows_pad, TN)  rows 0:P*M are theta rows
#                               [1, du, u*1, u*du, u^2*1, u^2*du, ...]
# ----------------------------------------------------------------------------
def _theta_kernel(u_ref, du_ref, theta_ref, *, poly_order, n_deriv_in, rows_pad):
    D = n_deriv_in
    M = D + 1                    # total derivative terms incl. the constant 1
    P = poly_order + 1

    du = du_ref[...]                                  # (D, TN) lane-dense
    TN = du.shape[1]
    u_b = jnp.broadcast_to(u_ref[...], (D, TN))       # hoisted sublane broadcast

    # p = 0 slab: [1, u_x, u_xx, ...]  (no u^0 multiply, ones made in-register)
    theta_ref[0:1, :] = jnp.ones((1, TN), jnp.float32)
    theta_ref[1:M, :] = du

    acc_b = u_b                                       # u^p, kept broadcast to D rows
    for p in range(1, P):
        base = p * M
        theta_ref[base:base + 1, :] = acc_b[0:1, :]   # u^p * 1
        theta_ref[base + 1:base + M, :] = acc_b * du  # u^p * [u_x, u_xx, ...]
        if p + 1 < P:
            acc_b = acc_b * u_b                       # u^(p+1), no re-broadcast

    # Zero the sublane padding rows so the full (rows_pad, TN) block is defined.
    if rows_pad > P * M:
        theta_ref[P * M:rows_pad, :] = jnp.zeros((rows_pad - P * M, TN), jnp.float32)


def _choose_tile(n128, max_tile):
    """Pick lane-tile TN (multiple of 128) and padded length n_pad."""
    max_tile = max(128, (max_tile // 128) * 128)
    if n128 > max_tile:
        tn = max_tile
    elif n128 >= 2048:
        # Enough work to split: keep >= 2 parallel tiles so v7x megacore can
        # shard across its two TensorCores.  On v5e/v6e (1 TC) this is neutral.
        tn = pl.cdiv(pl.cdiv(n128, 2), 128) * 128
    else:
        tn = n128
    n_pad = pl.cdiv(n128, tn) * tn
    return tn, n_pad


def build_theta(u, deriv_rows, poly_order, *, max_tile=32768, lane_dense=False):
    """u: (N,), deriv_rows: list of (N,) non-constant derivative terms.

    Returns theta (N, (poly_order+1)*(len(deriv_rows)+1)) f32, or the
    lane-dense transpose ((P*M), N) if lane_dense=True.
    """
    N = u.shape[0]
    D = len(deriv_rows)
    M = D + 1
    P = poly_order + 1
    rows_out = P * M
    rows_pad = pl.cdiv(rows_out, 8) * 8               # full-sublane output tiles

    n128 = pl.cdiv(N, 128) * 128
    TN, n_pad = _choose_tile(n128, max_tile)
    pad = n_pad - N

    # Build inputs directly in lane-dense transposed layout (single pad pass).
    u_t = u.astype(jnp.float32)
    du_t = jnp.stack([r.astype(jnp.float32) for r in deriv_rows], axis=0)  # (D, N)
    if pad:
        u_t = jnp.pad(u_t, (0, pad))
        du_t = jnp.pad(du_t, ((0, 0), (0, pad)))
    u_t = u_t.reshape(1, n_pad)

    theta_t = pl.pallas_call(
        functools.partial(
            _theta_kernel,
            poly_order=poly_order,
            n_deriv_in=D,
            rows_pad=rows_pad,
        ),
        out_shape=jax.ShapeDtypeStruct((rows_pad, n_pad), jnp.float32),
        grid_spec=pl.GridSpec(
            grid=(n_pad // TN,),
            in_specs=[
                pl.BlockSpec((1, TN), lambda i: (0, i)),
                pl.BlockSpec((D, TN), lambda i: (0, i)),
            ],
            out_specs=pl.BlockSpec((rows_pad, TN), lambda i: (0, i)),
        ),
        compiler_params=pltpu.CompilerParams(
            dimension_semantics=("parallel",),      # shard tiles over TCs on v7x
            vmem_limit_bytes=32 * 1024 * 1024,      # explicit; tiny footprint anyway
        ),
        cost_estimate=pl.CostEstimate(
            flops=rows_out * n_pad,                 # multiply-only, advisory
            transcendentals=0,
            bytes_accessed=4 * n_pad * (1 + D + rows_pad),
        ),
    )(u_t, du_t)

    theta_t = theta_t[:rows_out, :N]                # drop sublane + lane padding
    if lane_dense:
        # (P*M, N): best layout for downstream theta^T theta / theta^T u_t.
        return theta_t
    return theta_t.T                                # deepymod (N, P*M) layout


# ----------------------------------------------------------------------------
# library_func: deepymod `library_1D_in` equivalent (derivatives via JAX AD)
# ----------------------------------------------------------------------------
def library_1D_in(input, poly_order=2, diff_order=2, lane_dense_theta=False):
    # input = (predict_fn, data); data columns are (t, x) like deepymod.
    # TODO(synk): generic diff_order > 2 would need higher-order jets; fixed to 2.
    predict_fn, data = input
    assert diff_order == 2, "this synthetic library supports diff_order == 2"

    # u and first derivatives in one pass.
    u, grads = jax.vmap(jax.value_and_grad(predict_fn))(data)   # (N,), (N, 2)
    time_deriv = grads[:, 0:1].astype(jnp.float32)              # (N, 1)
    u_x = grads[:, 1]                                           # (N,)

    # u_xx via forward-over-reverse directional 2nd derivative (no full Hessian).
    e_x = jnp.array([0.0, 1.0], jnp.float32)

    def d2x(tx):
        return jax.jvp(jax.grad(predict_fn), (tx,), (e_x,))[1][1]

    u_xx = jax.vmap(d2x)(data)                                  # (N,)

    theta = build_theta(u, [u_x, u_xx], poly_order, lane_dense=lane_dense_theta)
    return [time_deriv], theta


# ----------------------------------------------------------------------------
# JAX mirror of the torch `Library` nn.Module
# ----------------------------------------------------------------------------
class Library:
    def __init__(self, library_func, library_args={}):
        self.library_func = library_func
        self.library_args = library_args

    def forward(self, input):
        self.time_deriv_list, self.theta = self.library_func(
            input, **self.library_args)
        return (self.time_deriv_list, self.theta)


# ----------------------------------------------------------------------------
# main
# ----------------------------------------------------------------------------
if __name__ == "__main__":
    key = jax.random.PRNGKey(0)
    k1, k2, k3, kd, k4, k5, k6 = jax.random.split(key, 7)

    # Small deterministic MLP u(t, x): 2 -> 16 -> 16 -> 1 (tanh)
    W1 = 0.5 * jax.random.normal(k1, (2, 16), jnp.float32)
    b1 = jnp.zeros((16,), jnp.float32)
    W2 = 0.5 * jax.random.normal(k2, (16, 16), jnp.float32)
    b2 = jnp.zeros((16,), jnp.float32)
    W3 = 0.5 * jax.random.normal(k3, (16, 1), jnp.float32)
    b3 = jnp.zeros((1,), jnp.float32)

    def predict_fn(tx):  # tx: (2,) = (t, x) -> scalar u
        h = jnp.tanh(tx @ W1 + b1)
        h = jnp.tanh(h @ W2 + b2)
        return (h @ W3 + b3)[0]

    N = 64  # not a multiple of 128 -> exercises the lane-padding path
    data = jax.random.normal(kd, (N, 2), jnp.float32)  # columns (t, x)

    lib = Library(library_1D_in, {"poly_order": 2, "diff_order": 2})
    time_deriv_list, theta = lib.forward((predict_fn, data))

    theta = jax.block_until_ready(theta)
    time_deriv = jax.block_until_ready(time_deriv_list[0])

    # Pure-JAX reference (independent AD path: full vmap grad + hessian).
    u_ref = jax.vmap(predict_fn)(data)[:, None]
    d1_ref = jax.vmap(jax.grad(predict_fn))(data)
    d2_ref = jax.vmap(jax.hessian(predict_fn))(data)
    deriv_ref = jnp.concatenate(
        [jnp.ones_like(u_ref), d1_ref[:, 1:2], d2_ref[:, 1, 1][:, None]], axis=1)
    poly_ref = jnp.concatenate([jnp.ones_like(u_ref), u_ref, u_ref * u_ref], axis=1)
    theta_ref = (poly_ref[:, :, None] * deriv_ref[:, None, :]).reshape(N, -1)

    assert theta.shape == (N, 9)
    assert time_deriv.shape == (N, 1)
    assert jnp.allclose(theta, theta_ref, atol=2e-5, rtol=1e-4)
    assert jnp.allclose(time_deriv, d1_ref[:, 0:1], atol=2e-5, rtol=1e-4)

    # Second check: multi-tile grid + lane padding + lane-dense return path.
    N2 = 300
    u2 = jax.random.normal(k4, (N2,), jnp.float32)
    r1 = jax.random.normal(k5, (N2,), jnp.float32)
    r2 = jax.random.normal(k6, (N2,), jnp.float32)
    th2 = jax.block_until_ready(build_theta(u2, [r1, r2], 2, max_tile=128))
    th2_ld = jax.block_until_ready(
        build_theta(u2, [r1, r2], 2, max_tile=128, lane_dense=True))
    poly2 = jnp.stack([jnp.ones_like(u2), u2, u2 * u2], axis=1)
    der2 = jnp.stack([jnp.ones_like(u2), r1, r2], axis=1)
    ref2 = (poly2[:, :, None] * der2[:, None, :]).reshape(N2, -1)
    assert th2.shape == (N2, 9)
    assert th2_ld.shape == (9, N2)
    assert jnp.allclose(th2, ref2, atol=1e-6, rtol=1e-6)
    assert jnp.allclose(th2_ld.T, ref2, atol=1e-6, rtol=1e-6)

    print("KERNEL_OK")
</pallas_src>

<mosaic_0001>
module attributes {stable_mosaic.version = 11 : i64} {
  func.func @_theta_kernel(%arg0: i32, %arg1: memref<1x128xf32, #tpu.memory_space<vmem>>, %arg2: memref<2x128xf32, #tpu.memory_space<vmem>>, %arg3: memref<16x128xf32, #tpu.memory_space<vmem>>) attributes {dimension_semantics = [#tpu.dimension_semantics<parallel>], iteration_bounds = array<i64: 1>, scalar_prefetch = 0 : i64, scratch_operands = 0 : i64, tpu.core_type = #tpu.core_type<tc>, window_params = [{transform_indices = @transform_0, window_bounds = array<i64: 1, 128>}, {transform_indices = @transform_1, window_bounds = array<i64: 2, 128>}, {transform_indices = @transform_2, window_bounds = array<i64: 16, 128>}]} {
    %c0 = arith.constant 0 : index
    %c0_0 = arith.constant 0 : index
    %0 = vector.load %arg2[%c0, %c0_0] : memref<2x128xf32, #tpu.memory_space<vmem>>, vector<2x128xf32>
    %c0_1 = arith.constant 0 : index
    %c0_2 = arith.constant 0 : index
    %1 = vector.load %arg1[%c0_1, %c0_2] : memref<1x128xf32, #tpu.memory_space<vmem>>, vector<1x128xf32>
    %2 = vector.shape_cast %1 : vector<1x128xf32> to vector<1x128xf32>
    %3 = vector.broadcast %2 : vector<1x128xf32> to vector<2x128xf32>
    %cst = arith.constant 1.000000e+00 : f32
    %4 = vector.broadcast %cst : f32 to vector<1x128xf32>
    %c0_3 = arith.constant 0 : index
    %c0_4 = arith.constant 0 : index
    %5 = vector.load %arg3[%c0_3, %c0_4] : memref<16x128xf32, #tpu.memory_space<vmem>>, vector<1x128xf32>
    tpu.vector_store %arg3[%c0_3, %c0_4], %4 {strides = array<i32>} : memref<16x128xf32, #tpu.memory_space<vmem>>, vector<1x128xf32>,
    %c1 = arith.constant 1 : index
    %c0_5 = arith.constant 0 : index
    %6 = vector.load %arg3[%c1, %c0_5] : memref<16x128xf32, #tpu.memory_space<vmem>>, vector<2x128xf32>
    tpu.vector_store %arg3[%c1, %c0_5], %0 {strides = array<i32>} : memref<16x128xf32, #tpu.memory_space<vmem>>, vector<2x128xf32>,
    %7 = vector.extract_strided_slice %3 {offsets = [0, 0], sizes = [1, 128], strides = [1, 1]} : vector<2x128xf32> to vector<1x128xf32>
    %c3 = arith.constant 3 : index
    %c0_6 = arith.constant 0 : index
    %8 = vector.load %arg3[%c3, %c0_6] : memref<16x128xf32, #tpu.memory_space<vmem>>, vector<1x128xf32>
    tpu.vector_store %arg3[%c3, %c0_6], %7 {strides = array<i32>} : memref<16x128xf32, #tpu.memory_space<vmem>>, vector<1x128xf32>,
    %9 = arith.mulf %3, %0 : vector<2x128xf32>
    %c4 = arith.constant 4 : index
    %c0_7 = arith.constant 0 : index
    %10 = vector.load %arg3[%c4, %c0_7] : memref<16x128xf32, #tpu.memory_space<vmem>>, vector<2x128xf32>
    tpu.vector_store %arg3[%c4, %c0_7], %9 {strides = array<i32>} : memref<16x128xf32, #tpu.memory_space<vmem>>, vector<2x128xf32>,
    %11 = arith.mulf %3, %3 : vector<2x128xf32>
    %12 = vector.extract_strided_slice %11 {offsets = [0, 0], sizes = [1, 128], strides = [1, 1]} : vector<2x128xf32> to vector<1x128xf32>
    %c6 = arith.constant 6 : index
    %c0_8 = arith.constant 0 : index
    %13 = vector.load %arg3[%c6, %c0_8] : memref<16x128xf32, #tpu.memory_space<vmem>>, vector<1x128xf32>
    tpu.vector_store %arg3[%c6, %c0_8], %12 {strides = array<i32>} : memref<16x128xf32, #tpu.memory_space<vmem>>, vector<1x128xf32>,
    %14 = arith.mulf %11, %0 : vector<2x128xf32>
    %c7 = arith.constant 7 : index
    %c0_9 = arith.constant 0 : index
    %15 = vector.load %arg3[%c7, %c0_9] : memref<16x128xf32, #tpu.memory_space<vmem>>, vector<2x128xf32>
    tpu.vector_store %arg3[%c7, %c0_9], %14 {strides = array<i32>} : memref<16x128xf32, #tpu.memory_space<vmem>>, vector<2x128xf32>,
    %cst_10 = arith.constant 0.000000e+00 : f32
    %16 = vector.broadcast %cst_10 : f32 to vector<7x128xf32>
    %c9 = arith.constant 9 : index
    %c0_11 = arith.constant 0 : index
    %17 = vector.load %arg3[%c9, %c0_11] : memref<16x128xf32, #tpu.memory_space<vmem>>, vector<7x128xf32>
    tpu.vector_store %arg3[%c9, %c0_11], %16 {strides = array<i32>} : memref<16x128xf32, #tpu.memory_space<vmem>>, vector<7x128xf32>,
    return
  }
  func.func @transform_0(%arg0: i32) -> (i32, i32) {
    %c0_i32 = arith.constant 0 : i32
    %c0_i32_0 = arith.constant 0 : i32
    return %c0_i32, %arg0 : i32, i32
  }
  func.func @transform_1(%arg0: i32) -> (i32, i32) {
    %c0_i32 = arith.constant 0 : i32
    %c0_i32_0 = arith.constant 0 : i32
    return %c0_i32, %arg0 : i32, i32
  }
  func.func @transform_2(%arg0: i32) -> (i32, i32) {
    %c0_i32 = arith.constant 0 : i32
    %c0_i32_0 = arith.constant 0 : i32
    return %c0_i32, %arg0 : i32, i32
  }
}

</mosaic_0001>

<bundles_post_ra>
// kernel: tpu_custom_call.1
= control target key start
LH: loop header
LB: loop body
LE: loop exit
PB: predicated region body
PF: predicated region fallthrough
CT: control target
= control target key end

     0   :  { %7 = vsyncpa [#allocation3], 0  ;;  %s192_s0 = inlined_call_operand.hbm [shape: f32[1,128], index: 0, kind: input, shape index: {}]   ;;  %s193_s1 = inlined_call_operand.hbm [shape: f32[2,128], index: 1, kind: input, shape index: {}]   ;;  %s194_s2 = inlined_call_operand.hbm [shape: f32[16,128], index: 2, kind: output, shape index: {}]  }
   0x1   :  { %8 = vsyncpa [#allocation6], 0 }
   0x2   :  { %9 = vsyncpa [#allocation4], 0  ;;  %s15_s11 = sshll.u32 %s192_s0, 4  ;;  %s161_s12 = smov [#allocation2]   ;;  %s16_s11 = int_to_ptr.hbm [resolvable:$true] %s15_s11 }
   0x3   :  { %s17_s13 = sshll.u32 %s161_s12, 4  ;;  %s26_s16 = sshll.u32 %s193_s1, 4  ;;  %s18_s13 = int_to_ptr.vmem [resolvable:$true] %s17_s13  ;;  %s27_s16 = int_to_ptr.hbm [resolvable:$true] %s26_s16 }
   0x4   :  { %20 = dma.hbm_to_vmem [thread:$0]  %s16_s11, 16, %s18_s13, [#allocation3]  }
   0x5   :  { %s162_s17 = smov [#allocation5]  }
   0x6   :  { %s28_s18 = sshll.u32 %s162_s17, 4  ;;  %s29_s18 = int_to_ptr.vmem [resolvable:$true] %s28_s18 }
   0x7   :  { %31 = dma.hbm_to_vmem [thread:$0]  %s27_s16, 32, %s29_s18, [#allocation6]  }
   0x8   :  { %155 = dma.done.wait [#allocation3], 16  }
   0x9   :  { %156 = vsyncadd [#allocation3], 4294967280 }
   0xa   :  { %157 = dma.done.wait [#allocation6], 32  }
   0xb   :  { %158 = vsyncadd [#allocation6], 4294967264  ;;  %v163_v0 = vmov 1.0   ;;  %v164_v1 = vmov 0.0   ;;  %s165_s0 = smov [#allocation7]   ;;  %s61_s1 = sshll.u32 %s194_s2, 4  ;;  %s62_s1 = int_to_ptr.hbm [resolvable:$true] %s61_s1 }
   0xc   :  { %45 = vst [vmem:[#allocation7] sm:$0x1] %v163_v0  ;;  %s59_s19 = sshll.u32 %s165_s0, 4  ;;  %v40_v2 = vld [vmem:[#allocation5] sm:$0x3]  ;;  %s166_s22 = smov 128   ;;  %s60_s19 = int_to_ptr.vmem [resolvable:$true] %s59_s19 }
   0xd   :  { %54 = vst [vmem:[#allocation7 + $0x9] sm:$0x7f] %v164_v1  ;;  %v41_v3 = vld [vmem:[#allocation2] sm:$0x1]  ;;  %s167_s23 = smov 8  }
   0xe   :  { %v82_v4 = vld [vmem:[#allocation2] ss:$0 sm:$0xff]  ;;  %46 = vst [vmem:[#allocation7 + $0x1] sm:$0x3] %v40_v2 }
   0xf   :  { %47 = vst [vmem:[#allocation7 + $0x3] sm:$0x1] %v41_v3  ;;  %v48_v5 = vmul.f32 %v82_v4, %v40_v2  ;;  %v50_v6 = vmul.f32 %v82_v4, %v82_v4 }
  0x11   :  { %49 = vst [vmem:[#allocation7 + $0x4] sm:$0x3] %v48_v5  ;;  %v52_v7 = vmul.f32 %v50_v6, %v40_v2 }
  0x12   :  { %51 = vst [vmem:[#allocation7 + $0x6] sm:$0x1] %v50_v6 }
  0x13   :  { %53 = vst [vmem:[#allocation7 + $0x7] sm:$0x3] %v52_v7 }
  0x14   :  { %67 = dma.vmem_to_hbm [thread:$0]  %s60_s19, 256, %s62_s1, [#allocation4], %s166_s22, %s166_s22, %s167_s23  }
  0x15   :  { %159 = dma.done.wait [#allocation4], 256  }
  0x16   :  { %160 = vsyncadd [#allocation4], 4294967040 }
  0x17   :  { %72 = vsyncpa [#allocation3], 1 }
  0x18   :  { %73 = vsyncpa [#allocation6], 1 }
  0x19   :  { %74 = vsyncpa [#allocation4], 1 }

</bundles_post_ra>
